<compile_context>
chip_gen: v7x
topology: tpu7x:2x2x1
jax: 0.10.0
libtpu: 0.0.40
codegen_flags: <defaults>
</compile_context>

<pallas_src>
import math
import jax
import jax.numpy as jnp
from jax.experimental import pallas as pl
from jax.experimental.pallas import tpu as pltpu


# ---------------------------------------------------------------------------
# Fused kernel: whole MLP in one pallas_call
# ---------------------------------------------------------------------------
def _make_fused_mlp_kernel(num_hidden):
    """Builds a kernel taking refs:
        x, [w, bn_scale, bn_shift'] * num_hidden, w_out, b_out, o
    All hidden-layer linear biases are pre-folded into bn_shift'."""

    def kernel(*refs):
        x_ref = refs[0]
        o_ref = refs[-1]

        h = x_ref[...]
        idx = 1
        for _ in range(num_hidden):
            w_ref = refs[idx]
            scale_ref = refs[idx + 1]
            shift_ref = refs[idx + 2]
            idx += 3
            # Linear (bias folded into shift) + BatchNorm1d(eval) + ReLU.
            # Dropout is identity in eval mode.
            y = jnp.dot(h, w_ref[...], preferred_element_type=jnp.float32)
            y = y * scale_ref[...] + shift_ref[...]
            h = jnp.maximum(y, 0.0)

        # Output Linear + Softmax(dim=1), numerically stabilized.
        w_ref = refs[idx]
        b_ref = refs[idx + 1]
        logits = jnp.dot(h, w_ref[...], preferred_element_type=jnp.float32)
        logits = logits + b_ref[...]
        m = jnp.max(logits, axis=1, keepdims=True)
        e = jnp.exp(logits - m)
        denom = jnp.sum(e, axis=1, keepdims=True)
        # EUP reciprocal (exact) + VPU multiply instead of a vector divide.
        o_ref[...] = e * pl.reciprocal(denom, approx=False)

    return kernel


def fully_connected_forward(x, params):
    """Single fused pallas_call over the whole MLP (everything fits VMEM)."""
    num_hidden = len(params["hidden"])
    flat_inputs = [x]
    for (w, scale, shift) in params["hidden"]:
        flat_inputs += [w, scale, shift]
    flat_inputs += [params["out_w"], params["out_b"]]

    B = x.shape[0]
    O = params["out_w"].shape[1]

    # grid=() / full-array blocks: no pipelining needed, everything is tiny and
    # VMEM-resident. Only the final (B, O) output is written back to HBM.
    in_specs = [pl.BlockSpec(memory_space=pltpu.MemorySpace.VMEM)
                for _ in flat_inputs]
    out_spec = pl.BlockSpec(memory_space=pltpu.MemorySpace.VMEM)

    return pl.pallas_call(
        _make_fused_mlp_kernel(num_hidden),
        out_shape=jax.ShapeDtypeStruct((B, O), jnp.float32),
        in_specs=in_specs,
        out_specs=out_spec,
    )(*flat_inputs)


# ---------------------------------------------------------------------------
# Parameter construction (deterministic, PyTorch-default-style init)
# ---------------------------------------------------------------------------
def init_params(key, input_size, hidden_sizes, output_size):
    eps = 1e-5
    hidden_folded = []   # (w, scale, shift') used by the kernel
    hidden_raw = []      # (w, b, gamma, beta, mean, var) used by the reference
    prev = input_size
    for h in hidden_sizes:
        key, kw, kb, kg, kbeta = jax.random.split(key, 5)
        bound = 1.0 / math.sqrt(prev)
        w = jax.random.uniform(kw, (prev, h), jnp.float32, -bound, bound)  # stored as W^T
        b = jax.random.uniform(kb, (1, h), jnp.float32, -bound, bound)
        gamma = jax.random.uniform(kg, (1, h), jnp.float32, 0.5, 1.5)
        beta = jax.random.uniform(kbeta, (1, h), jnp.float32, -0.5, 0.5)
        running_mean = jnp.zeros((1, h), jnp.float32)
        running_var = jnp.ones((1, h), jnp.float32)
        # Fold BN (eval mode) AND the linear bias into one scale/shift:
        #   (x@W + b - mean) * gamma/sqrt(var+eps) + beta
        # = (x@W) * scale + (b - mean) * scale + beta
        scale = gamma / jnp.sqrt(running_var + eps)
        shift = beta + (b - running_mean) * scale
        hidden_folded.append((w, scale, shift))
        hidden_raw.append((w, b, gamma, beta, running_mean, running_var))
        prev = h

    key, kw, kb = jax.random.split(key, 3)
    bound = 1.0 / math.sqrt(prev)
    out_w = jax.random.uniform(kw, (prev, output_size), jnp.float32, -bound, bound)
    out_b = jax.random.uniform(kb, (1, output_size), jnp.float32, -bound, bound)

    return {
        "hidden": hidden_folded,
        "hidden_raw": hidden_raw,
        "out_w": out_w,
        "out_b": out_b,
    }


# ---------------------------------------------------------------------------
# Reference (pure JAX, unfused PyTorch-eval math) for a sanity check
# ---------------------------------------------------------------------------
def reference_forward(x, params):
    eps = 1e-5
    h = x
    for (w, b, gamma, beta, mean, var) in params["hidden_raw"]:
        y = h @ w + b                                  # Linear
        y = (y - mean) / jnp.sqrt(var + eps) * gamma + beta  # BatchNorm1d (eval)
        h = jnp.maximum(y, 0.0)                        # Dropout(identity) + ReLU
    logits = h @ params["out_w"] + params["out_b"]
    return jax.nn.softmax(logits, axis=1)


if __name__ == "__main__":
    input_size = 32
    hidden_sizes = [64, 32]
    output_size = 16
    batch = 8

    key = jax.random.PRNGKey(0)
    key, kx = jax.random.split(key)
    x = jax.random.normal(kx, (batch, input_size), jnp.float32)

    params = init_params(key, input_size, hidden_sizes, output_size)

    out = fully_connected_forward(x, params)
    out = jax.block_until_ready(out)

    ref = reference_forward(x, params)
    assert out.shape == (batch, output_size)
    assert jnp.allclose(out, ref, atol=1e-5, rtol=1e-5), "mismatch vs JAX reference"
    # softmax rows sum to 1
    assert jnp.allclose(jnp.sum(out, axis=1), jnp.ones((batch,)), atol=1e-5)

    # TODO(synk): training-mode BatchNorm1d (batch statistics) and stochastic
    # Dropout are not implemented; this is the eval-mode forward pass.
    print("KERNEL_OK")
</pallas_src>

<mosaic_0001>
module attributes {stable_mosaic.version = 11 : i64} {
  func.func @kernel(%arg0: memref<8x32xf32, #tpu.memory_space<vmem>>, %arg1: memref<32x64xf32, #tpu.memory_space<vmem>>, %arg2: memref<1x64xf32, #tpu.memory_space<vmem>>, %arg3: memref<1x64xf32, #tpu.memory_space<vmem>>, %arg4: memref<64x32xf32, #tpu.memory_space<vmem>>, %arg5: memref<1x32xf32, #tpu.memory_space<vmem>>, %arg6: memref<1x32xf32, #tpu.memory_space<vmem>>, %arg7: memref<32x16xf32, #tpu.memory_space<vmem>>, %arg8: memref<1x16xf32, #tpu.memory_space<vmem>>, %arg9: memref<8x16xf32, #tpu.memory_space<vmem>>) attributes {dimension_semantics = [], scalar_prefetch = 0 : i64, scratch_operands = 0 : i64, tpu.core_type = #tpu.core_type<tc>} {
    %c0 = arith.constant 0 : index
    %c0_0 = arith.constant 0 : index
    %0 = vector.load %arg0[%c0, %c0_0] : memref<8x32xf32, #tpu.memory_space<vmem>>, vector<8x32xf32>
    %c0_1 = arith.constant 0 : index
    %c0_2 = arith.constant 0 : index
    %1 = vector.load %arg1[%c0_1, %c0_2] : memref<32x64xf32, #tpu.memory_space<vmem>>, vector<32x64xf32>
    %cst = arith.constant dense<0.000000e+00> : vector<8x64xf32>
    %2 = tpu.matmul %0, %1, %cst {dimension_numbers = #tpu.dot_dimension_numbers<[1], [0], [0], [1], [0, 0, 1, 1], [], []>} : vector<8x32xf32>, vector<32x64xf32>, vector<8x64xf32> -> vector<8x64xf32>
    %c0_3 = arith.constant 0 : index
    %c0_4 = arith.constant 0 : index
    %3 = vector.load %arg2[%c0_3, %c0_4] : memref<1x64xf32, #tpu.memory_space<vmem>>, vector<1x64xf32>
    %4 = vector.broadcast %3 : vector<1x64xf32> to vector<8x64xf32>
    %5 = arith.mulf %2, %4 : vector<8x64xf32>
    %c0_5 = arith.constant 0 : index
    %c0_6 = arith.constant 0 : index
    %6 = vector.load %arg3[%c0_5, %c0_6] : memref<1x64xf32, #tpu.memory_space<vmem>>, vector<1x64xf32>
    %7 = vector.broadcast %6 : vector<1x64xf32> to vector<8x64xf32>
    %8 = arith.addf %5, %7 : vector<8x64xf32>
    %cst_7 = arith.constant 0.000000e+00 : f32
    %9 = vector.broadcast %cst_7 : f32 to vector<8x64xf32>
    %10 = arith.maximumf %8, %9 : vector<8x64xf32>
    %c0_8 = arith.constant 0 : index
    %c0_9 = arith.constant 0 : index
    %11 = vector.load %arg4[%c0_8, %c0_9] : memref<64x32xf32, #tpu.memory_space<vmem>>, vector<64x32xf32>
    %cst_10 = arith.constant dense<0.000000e+00> : vector<8x32xf32>
    %12 = tpu.matmul %10, %11, %cst_10 {dimension_numbers = #tpu.dot_dimension_numbers<[1], [0], [0], [1], [0, 0, 1, 1], [], []>} : vector<8x64xf32>, vector<64x32xf32>, vector<8x32xf32> -> vector<8x32xf32>
    %c0_11 = arith.constant 0 : index
    %c0_12 = arith.constant 0 : index
    %13 = vector.load %arg5[%c0_11, %c0_12] : memref<1x32xf32, #tpu.memory_space<vmem>>, vector<1x32xf32>
    %14 = vector.broadcast %13 : vector<1x32xf32> to vector<8x32xf32>
    %15 = arith.mulf %12, %14 : vector<8x32xf32>
    %c0_13 = arith.constant 0 : index
    %c0_14 = arith.constant 0 : index
    %16 = vector.load %arg6[%c0_13, %c0_14] : memref<1x32xf32, #tpu.memory_space<vmem>>, vector<1x32xf32>
    %17 = vector.broadcast %16 : vector<1x32xf32> to vector<8x32xf32>
    %18 = arith.addf %15, %17 : vector<8x32xf32>
    %cst_15 = arith.constant 0.000000e+00 : f32
    %19 = vector.broadcast %cst_15 : f32 to vector<8x32xf32>
    %20 = arith.maximumf %18, %19 : vector<8x32xf32>
    %c0_16 = arith.constant 0 : index
    %c0_17 = arith.constant 0 : index
    %21 = vector.load %arg7[%c0_16, %c0_17] : memref<32x16xf32, #tpu.memory_space<vmem>>, vector<32x16xf32>
    %cst_18 = arith.constant dense<0.000000e+00> : vector<8x16xf32>
    %22 = tpu.matmul %20, %21, %cst_18 {dimension_numbers = #tpu.dot_dimension_numbers<[1], [0], [0], [1], [0, 0, 1, 1], [], []>} : vector<8x32xf32>, vector<32x16xf32>, vector<8x16xf32> -> vector<8x16xf32>
    %c0_19 = arith.constant 0 : index
    %c0_20 = arith.constant 0 : index
    %23 = vector.load %arg8[%c0_19, %c0_20] : memref<1x16xf32, #tpu.memory_space<vmem>>, vector<1x16xf32>
    %24 = vector.broadcast %23 : vector<1x16xf32> to vector<8x16xf32>
    %25 = arith.addf %22, %24 : vector<8x16xf32>
    %cst_21 = arith.constant dense<0xFF800000> : vector<8xf32>
    %26 = vector.multi_reduction <maximumf>, %25, %cst_21 [1] : vector<8x16xf32> to vector<8xf32>
    %27 = vector.shape_cast %26 : vector<8xf32> to vector<8x1xf32>
    %28 = vector.broadcast %27 : vector<8x1xf32> to vector<8x16xf32>
    %29 = arith.subf %25, %28 : vector<8x16xf32>
    %30 = math.exp %29 : vector<8x16xf32>
    %cst_22 = arith.constant dense<0.000000e+00> : vector<8xf32>
    %31 = vector.multi_reduction <add>, %30, %cst_22 [1] : vector<8x16xf32> to vector<8xf32>
    %32 = vector.shape_cast %31 : vector<8xf32> to vector<8x1xf32>
    %33 = tpu.reciprocal %32 : vector<8x1xf32> -> vector<8x1xf32>
    %34 = vector.broadcast %33 : vector<8x1xf32> to vector<8x16xf32>
    %35 = arith.mulf %30, %34 : vector<8x16xf32>
    %c0_23 = arith.constant 0 : index
    %c0_24 = arith.constant 0 : index
    %36 = vector.load %arg9[%c0_23, %c0_24] : memref<8x16xf32, #tpu.memory_space<vmem>>, vector<8x16xf32>
    tpu.vector_store %arg9[%c0_23, %c0_24], %35 {strides = array<i32>} : memref<8x16xf32, #tpu.memory_space<vmem>>, vector<8x16xf32>,
    return
  }
}

</mosaic_0001>

<bundles_post_ra>
// kernel: tpu_custom_call.1
= control target key start
LH: loop header
LB: loop body
LE: loop exit
PB: predicated region body
PF: predicated region fallthrough
CT: control target
= control target key end

     0   :  { %v463_v3 = vmov 0.0|0.0   ;;  %vm464_vm0 = vmmov 0   ;;  %v465_v6 = vmov 0.0   ;;  %s603_s0 = inlined_call_operand.vmem [shape: f32[8,32], index: 0, kind: input, shape index: {}]   ;;  %s604_s1 = inlined_call_operand.vmem [shape: f32[32,64], index: 1, kind: input, shape index: {}]   ;;  %s605_s2 = inlined_call_operand.vmem [shape: f32[1,64], index: 2, kind: input, shape index: {}]   ;;  %s606_s3 = inlined_call_operand.vmem [shape: f32[1,64], index: 3, kind: input, shape index: {}]   ;;  %s607_s4 = inlined_call_operand.vmem [shape: f32[64,32], index: 4, kind: input, shape index: {}]   ;;  %s608_s5 = inlined_call_operand.vmem [shape: f32[1,32], index: 5, kind: input, shape index: {}]   ;;  %s609_s6 = inlined_call_operand.vmem [shape: f32[1,32], index: 6, kind: input, shape index: {}]   ;;  %s610_s7 = inlined_call_operand.vmem [shape: f32[32,16], index: 7, kind: input, shape index: {}]   ;;  %s611_s8 = inlined_call_operand.vmem [shape: f32[1,16], index: 8, kind: input, shape index: {}]   ;;  %s612_s9 = inlined_call_operand.hbm [shape: f32[8,16], index: 9, kind: output, shape index: {}]  }
   0x1   :  { %v34_v0 = vld [vmem:[%s604_s1] sm:$0xff]  ;;  %v35_v1 = vld [vmem:[%s604_s1 + $0x8] sm:$0xff]  ;;  %v36_v2 = vld [vmem:[%s604_s1 + $0x10] sm:$0xff]  ;;  %407 = vmatprep.subr.bf16.mxu0 %v463_v3  ;;  %374 = vmatprep.mubr.msk.f32.mxu0 %vm464_vm0, %v465_v6 }
   0x2   :  { %v408_v4 = vpack.c.bf16 %v35_v1, %v34_v0  ;;  %v37_v5 = vld [vmem:[%s604_s1 + $0x18] sm:$0xff]  ;;  %v129_v7 = vld [vmem:[%s607_s4] sm:$0xff]  ;;  %413 = vmatprep.subr.bf16.mxu1 %v463_v3  ;;  %v130_v8 = vld [vmem:[%s607_s4 + $0x8] sm:$0xff]  ;;  %393 = vmatprep.mubr.msk.f32.mxu1 %vm464_vm0, %v465_v6 }
   0x3   :  { %v131_v9 = vld [vmem:[%s607_s4 + $0x10] sm:$0xff]  ;;  %v132_v10 = vld [vmem:[%s607_s4 + $0x18] sm:$0xff]  ;;  %v411_v11 = vpack.c.bf16 %v37_v5, %v36_v2  ;;  %v414_v12 = vpack.c.bf16 %v130_v8, %v129_v7 }
   0x4   :  { %409 = vmatpush3.bf16.msra.mxu0 %v408_v4 }
   0x5   :  { %14 = vsyncpa [#allocation3], 0  ;;  %410 = vmatprep.subr.bf16.mxu0 %v463_v3  ;;  %415 = vmatpush3.bf16.msra.mxu1 %v414_v12  ;;  %v417_v13 = vpack.c.bf16 %v132_v10, %v131_v9  ;;  %v33_v14 = vld [vmem:[%s603_s0] sm:$0xff]  ;;  %vm38_vm1 = vcmask 261120   ;;  %v134_v16 = vld [vmem:[%s607_s4 + $0x28] sm:$0xff]  ;;  %vm137_vm2 = vcmask 523264  }
   0x6   :  { %416 = vmatprep.subr.bf16.mxu1 %v463_v3  ;;  %v133_v15 = vld [vmem:[%s607_s4 + $0x20] sm:$0xff]  ;;  %v135_v18 = vld [vmem:[%s607_s4 + $0x30] sm:$0xff]  ;;  %v136_v19 = vld [vmem:[%s607_s4 + $0x38] sm:$0xff]  ;;  %vm312_vm3 = vcmask 130048  }
   0x7   :  { %v420_v17 = vpack.c.bf16 %v134_v16, %v133_v15  ;;  %v423_v20 = vpack.c.bf16 %v136_v19, %v135_v18  ;;  %v340_v21 = vld [vmem:[%s605_s2] ss:$0 sm:$0xff]  ;;  %v229_v29 = vld [vmem:[%s610_s7 + $0x8] sm:$0xff]  ;;  %v230_v31 = vld [vmem:[%s610_s7 + $0x10] sm:$0xff] }
   0x8   :  { %412 = vmatpush3.bf16.msra.mxu0 %v411_v11  ;;  %v341_v23 = vld [vmem:[%s606_s3] ss:$0 sm:$0xff]  ;;  %v231_v32 = vld [vmem:[%s610_s7 + $0x18] sm:$0xff] }
   0x9   :  { %425 = vmatprep.subr.bf16.mxu0 %v463_v3  ;;  %418 = vmatpush3.bf16.msra.mxu1 %v417_v13  ;;  %v228_v28 = vld [vmem:[%s610_s7] sm:$0xff]  ;;  %v429_v33 = vpack.c.bf16 %v231_v32, %v230_v31 }
   0xa   :  { %419 = vmatprep.subr.bf16.mxu1 %v463_v3  ;;  %v426_v30 = vpack.c.bf16 %v229_v29, %v228_v28  ;;  %v343_v34 = vld [vmem:[%s608_s5] ss:$0 sm:$0xff]  ;;  %s466_s5 = smov [#allocation2]  }
   0xb   :  { %375 = vmatmul.mubr.msk.f32.vlgmr.msra.gmra.mrb[0].mxu0 %vm38_vm1, %v33_v14  ;;  %v344_v36 = vld [vmem:[%s609_s6] ss:$0 sm:$0xff]  ;;  %s331_s6 = sshll.u32 %s466_s5, 4  ;;  %s332_s6 = int_to_ptr.vmem [resolvable:$true] %s331_s6 }
   0xc   :  { %404 = vmatprep.mubr.msk.f32.mxu0 %vm464_vm0, %v465_v6  ;;  %427 = vmatpush3.bf16.msra.mxu0 %v426_v30  ;;  %v345_v41 = vld [vmem:[%s611_s8] ss:$0 sm:$0xff]  ;;  %s439_s7 = scalar_lea.vmem %s332_s6, 128  ;;  %p444_p1 = scmp.lt.s32.totalorder %s332_s6, %s332_s6 }
   0xd   :  { %421 = vmatpush3.bf16.msra.mxu1 %v420_v17  ;;  %428 = vmatprep.subr.bf16.mxu0 %v463_v3  ;;  %p440_p0 = scmp.ne.s32.totalorder %s332_s6, %s439_s7  ;;  %p445_p2 = scmp.lt.s32.totalorder %s439_s7, %s439_s7 }
   0xe   :  { %422 = vmatprep.subr.bf16.mxu1 %v463_v3 }
   0xf   :  { %p446_p3 = por %p445_p2, %p444_p1 }
  0x10   :  { %430 = vmatpush3.bf16.msra.mxu0 %v429_v33 }
  0x11   :  { %424 = vmatpush3.bf16.msra.mxu1 %v423_v20  ;;  %p447_p4 = pnand %p446_p3, %p440_p0 }
  0xde   :  { %v108_v22 = vpop.f32.mrb[0].mxu0 }
  0xdf   :  { %v119_v24 = vmul.f32 %v340_v21, %v108_v22  ;;  %v376_v25 = vpop.f32.mrb[1].mxu0 }
  0xe1   :  { %v127_v26 = vadd.f32 %v341_v23, %v119_v24 }
  0xe3   :  { %v128_v27 = vmax.f32 %v127_v26, 0.0 }
  0xe5   :  { %394 = vmatmul.mubr.msk.f32.vlgmr.msra.gmra.mrb[0].mxu1 %vm137_vm2, %v128_v27 }
 0x1b8   :  { %v207_v35 = vpop.f32.mrb[0].mxu1 }
 0x1b9   :  { %v218_v37 = vmul.f32 %v343_v34, %v207_v35  ;;  %v395_v38 = vpop.f32.mrb[1].mxu1 }
 0x1bb   :  { %v226_v39 = vadd.f32 %v344_v36, %v218_v37 }
 0x1bd   :  { %v227_v40 = vmax.f32 %v226_v39, 0.0 }
 0x1bf   :  { %405 = vmatmul.mubr.msk.f32.vlgmr.msra.gmra.mrb[2].mxu0 %vm38_vm1, %v227_v40 }
 0x292   :  { %v308_v42 = vpop.f32.mrb[2].mxu0 }
 0x293   :  { %v309_v43 = vadd.f32 %v345_v41, %v308_v42  ;;  %v406_v44 = vpop.f32.mrb[3].mxu0 }
 0x295   :  { %v313_v45 = vsel %vm312_vm3, %v309_v43, -inf }
 0x296   :  { %314 = vmax.xlane.f32.xlu0 %v313_v45 }
 0x323   :  { %v315_v46 = vpop.xlane.xlu0 %314 }
 0x324   :  { %v316_v47 = vsub.f32 %v309_v43, %v315_v46 }
 0x326   :  { %v317_v48 = vmul.f32 1.442695, %v316_v47 }
 0x328   :  { %435 = vpow2.f32 %v317_v48 }
 0x332   :  { %v436_v49 = vpop.eup %435 }
 0x333   :  { %v319_v50 = vsel %vm312_vm3, %v436_v49, 0.0 }
 0x334   :  { %320 = vadd.xlane.f32.xlu0 %v319_v50 }
 0x3c1   :  { %v321_v51 = vpop.xlane.xlu0 %320 }
 0x3c2   :  { %437 = vrcp.f32 %v321_v51 }
 0x3cc   :  { %v438_v52 = vpop.eup %437 }
 0x3cd   :  { %v323_v53 = vmul.f32 %v438_v52, %v436_v49 }
 0x3cf   :  { %324 = vst.msk [vmem:[#allocation2] sm:$0xff] %vm312_vm3, %v323_v53 }
 0x3d0   :  { %450 = shalt.err (!%p447_p4)
}
 0x3d1   :  { %s451_s27 = scalar_lea.hbm %s612_s9, 128 }
 0x3d2   :  { %p452_p5 = scmp.ne.s32.totalorder %s612_s9, %s451_s27  ;;  %p455_p6 = scmp.lt.u32.totalorder %s451_s27, %s612_s9 }
 0x3d4   :  { %p457_p7 = pnand %p455_p6, %p452_p5 }
 0x3d6   :  { %460 = shalt.err (!%p457_p7)
}
 0x3d7   :  { %334 = dma.vmem_to_hbm [thread:$0]  %s332_s6, 128, %s612_s9, [#allocation3]  }
 0x3d8   :  { %461 = dma.done.wait [#allocation3], 128  }
 0x3d9   :  { %462 = vsyncadd [#allocation3], 4294967168 }
 0x3da   :  { %338 = vsyncpa [#allocation3], 1 }

</bundles_post_ra>
